<compile_context>
chip_gen: v5e
topology: v5e:2x2
jax: 0.10.0
libtpu: 0.0.40
codegen_flags: <defaults>
</compile_context>

<pallas_src>
import functools

import jax
import jax.numpy as jnp
from jax.experimental import pallas as pl
from jax.experimental.pallas import tpu as pltpu


def _gelu_tanh(x):
    # GELU(approximate='tanh'):  0.5*x*(1 + tanh(sqrt(2/pi)*(x + 0.044715*x^3)))
    c = jnp.sqrt(2.0 / jnp.pi).astype(x.dtype)
    return 0.5 * x * (1.0 + jnp.tanh(c * (x + 0.044715 * (x * x * x))))


def _round_up(n, m):
    return ((n + m - 1) // m) * m


def _device_kind():
    try:
        return jax.devices()[0].device_kind.lower()
    except Exception:
        return ""


def mlp_kernel(x_ref, w1_ref, b1_ref, w2_ref, b2_ref, o_ref, *,
               h_chunk, n_chunks, compute_dtype, gelu_dtype):
    # x_ref:  (tile_m, Cp)  input dtype (cast to compute dtype inside the kernel)
    # w1_ref: (Cp, Hp)      compute dtype      b1_ref: (1, Hp) f32
    # w2_ref: (Hp, Cp)      compute dtype      b2_ref: (1, Cp) f32
    # o_ref:  (tile_m, Cp)  output dtype
    x = x_ref[...].astype(compute_dtype)
    tm = x.shape[0]
    cp = o_ref.shape[-1]

    def chunk(lo, acc):
        sl = pl.ds(lo, h_chunk)
        # first matmul chunk: (tm, Cp) @ (Cp, hc) -> f32 accumulate on the MXU
        h = jnp.dot(x, w1_ref[:, sl], preferred_element_type=jnp.float32)
        # bias-add + GELU in gelu_dtype (bf16 on v6e/v7x, f32 on v5e / f32 path)
        h = h.astype(gelu_dtype) + b1_ref[:, sl].astype(gelu_dtype)
        g = _gelu_tanh(h)
        # second matmul chunk accumulated in f32
        return acc + jnp.dot(g.astype(compute_dtype), w2_ref[sl, :],
                             preferred_element_type=jnp.float32)

    acc = jnp.zeros((tm, cp), jnp.float32)
    if n_chunks <= 2:
        # Short, known trip count: static unroll is fine.
        for s in range(n_chunks):
            acc = chunk(s * h_chunk, acc)
    else:
        # Bounded loop keeps live ranges / vreg pressure under control.
        acc = jax.lax.fori_loop(
            0, n_chunks,
            lambda s, a: chunk(pl.multiple_of(s * h_chunk, 128), a),
            acc, unroll=True)

    o_ref[...] = (acc + b2_ref[...].astype(jnp.float32)).astype(o_ref.dtype)


def mlp_pallas(x, w1, b1, w2, b2, *, tile_m=None, h_chunk=2048,
               compute_dtype=jnp.bfloat16, gelu_dtype=None, out_dtype=None):
    """x: (B, T, C).  w1: (C, 4C), b1: (4C,), w2: (4C, C), b2: (C,).
    Returns (B, T, C) in out_dtype (default: x.dtype)."""
    B, T, C = x.shape
    Cin, H = w1.shape
    assert Cin == C and w2.shape == (H, C) and b1.shape == (H,) and b2.shape == (C,)
    M = B * T
    out_dtype = jnp.dtype(out_dtype if out_dtype is not None else x.dtype)
    compute_dtype = jnp.dtype(compute_dtype)

    kind = _device_kind()
    is_v5 = "v5" in kind
    is_v7 = "v7" in kind

    if tile_m is None:
        tile_m = 256 if is_v5 else 512       # v5e MXU is 4x128^2; v6e/v7x like taller tiles
    if gelu_dtype is None:
        # bf16 bias-add/GELU only where VPU/EUP are bf16-capable (v6e/v7x).
        gelu_dtype = compute_dtype if (compute_dtype == jnp.bfloat16 and not is_v5) \
            else jnp.float32
    gelu_dtype = jnp.dtype(gelu_dtype)

    # Lane-dense / tile-aligned padded sizes.
    Cp = _round_up(C, 128)
    Hp = _round_up(H, 128)
    tile_m = _round_up(max(8, min(tile_m, _round_up(M, 8))), 8)   # don't over-pad tiny M
    Mp = _round_up(M, tile_m)

    # Hidden-dim chunk width: a multiple of 128 that divides Hp.
    hc = max(128, (min(h_chunk, Hp) // 128) * 128)
    while Hp % hc:
        hc -= 128
    n_chunks = Hp // hc

    # Inputs: pad only when necessary; activation dtype cast happens inside the
    # kernel (avoids an extra wrapper-side HBM round-trip of the activations).
    x2d = x.reshape(M, C)
    if (Mp, Cp) != (M, C):
        x2d = jnp.pad(x2d, ((0, Mp - M), (0, Cp - C)))
    w1p = w1 if (Cp, Hp) == (C, H) else jnp.pad(w1, ((0, Cp - C), (0, Hp - H)))
    w2p = w2 if (Hp, Cp) == (H, C) else jnp.pad(w2, ((0, Hp - H), (0, Cp - C)))
    w1p = w1p.astype(compute_dtype)
    w2p = w2p.astype(compute_dtype)
    b1p = jnp.pad(b1, (0, Hp - H)).reshape(1, Hp).astype(jnp.float32)
    b2p = jnp.pad(b2, (0, Cp - C)).reshape(1, Cp).astype(jnp.float32)

    # VMEM budget: resident (single-buffered) weights + double-buffered x/out
    # tiles + f32 intermediates, with margin; capped per-chip.
    w_item = compute_dtype.itemsize
    weights_bytes = (Cp * Hp + Hp * Cp) * w_item + (Hp + Cp) * 4
    stream_bytes = 2 * tile_m * Cp * (x.dtype.itemsize + out_dtype.itemsize)
    interm_bytes = tile_m * (2 * hc + 2 * Cp) * 4
    need = weights_bytes + stream_bytes + interm_bytes + (8 << 20)
    cap = (56 << 20) if is_v7 else (100 << 20)
    vmem_limit = int(min(max(need, 16 << 20), cap))
    # TODO(synk): if bf16 W1+W2 alone exceed ~40 MiB on v7x (GPT-2 XL scale),
    # stream hidden-dim weight chunks over an extra "arbitrary" grid axis with an
    # f32 VMEM accumulator instead of keeping the weights fully resident.

    # Advisory cost estimate (padded shapes, matching what the kernel runs).
    flops = 4 * Mp * Cp * Hp
    transcendentals = Mp * Hp
    bytes_accessed = int(
        sum(int(a.size) * a.dtype.itemsize for a in (x2d, w1p, b1p, w2p, b2p))
        + Mp * Cp * out_dtype.itemsize)

    kernel = functools.partial(mlp_kernel, h_chunk=hc, n_chunks=n_chunks,
                               compute_dtype=compute_dtype, gelu_dtype=gelu_dtype)

    def run(resident_mode):
        wkw = {} if resident_mode is None else {"pipeline_mode": resident_mode}
        grid_spec = pltpu.PrefetchScalarGridSpec(
            num_scalar_prefetch=0,
            grid=(Mp // tile_m,),
            in_specs=[
                pl.BlockSpec((tile_m, Cp), lambda i: (i, 0)),        # x tile (streamed)
                pl.BlockSpec((Cp, Hp), lambda i: (0, 0), **wkw),     # W1 (resident)
                pl.BlockSpec((1, Hp), lambda i: (0, 0), **wkw),      # b1 (resident, f32)
                pl.BlockSpec((Hp, Cp), lambda i: (0, 0), **wkw),     # W2 (resident)
                pl.BlockSpec((1, Cp), lambda i: (0, 0), **wkw),      # b2 (resident, f32)
            ],
            out_specs=pl.BlockSpec((tile_m, Cp), lambda i: (i, 0)),
        )
        return pl.pallas_call(
            kernel,
            out_shape=jax.ShapeDtypeStruct((Mp, Cp), out_dtype),
            grid_spec=grid_spec,
            compiler_params=pltpu.CompilerParams(
                dimension_semantics=("parallel",),      # megacore / v7x dual-TC sharding
                vmem_limit_bytes=vmem_limit),
            cost_estimate=pl.CostEstimate(
                flops=flops,
                transcendentals=transcendentals,
                bytes_accessed=bytes_accessed),
        )(x2d, w1p, b1p, w2p, b2p)

    try:
        out = run(pl.Buffered(1))     # constant-index weights: single buffer suffices
    except Exception:
        out = run(None)               # fallback to default double-buffering

    return out[:M, :C].reshape(B, T, C).astype(out_dtype)


def mlp_reference(x, w1, b1, w2, b2):
    h = jnp.einsum("btc,ch->bth", x, w1) + b1
    g = _gelu_tanh(h)
    return jnp.einsum("bth,hc->btc", g, w2) + b2


if __name__ == "__main__":
    # config: n_embd=32 -> hidden=128; batch=2, seq=8
    B, T, C = 2, 8, 32
    H = 4 * C

    key = jax.random.PRNGKey(0)
    kx, k1, k2, k3, k4 = jax.random.split(key, 5)

    x = jax.random.normal(kx, (B, T, C), dtype=jnp.float32)
    # deterministic synthetic params (nn.Linear shapes, stored transposed)
    w1 = jax.random.normal(k1, (C, H), dtype=jnp.float32) * 0.02   # c_fc.weight.T
    b1 = jax.random.normal(k2, (H,), dtype=jnp.float32) * 0.02     # c_fc.bias
    w2 = jax.random.normal(k3, (H, C), dtype=jnp.float32) * 0.02   # c_proj.weight.T
    b2 = jax.random.normal(k4, (C,), dtype=jnp.float32) * 0.02     # c_proj.bias

    y_ref = mlp_reference(x, w1, b1, w2, b2)

    # 1) full-f32 compute path: must match the reference tightly.
    y_f32 = jax.block_until_ready(
        mlp_pallas(x, w1, b1, w2, b2, compute_dtype=jnp.float32))
    assert y_f32.shape == (B, T, C)
    assert jnp.allclose(y_f32, y_ref, atol=1e-5, rtol=1e-5), "f32 path mismatch"

    # 2) default mixed precision (bf16 MXU inputs, f32 accumulation; bf16 GELU on
    #    v6e/v7x, f32 GELU on v5e).
    y_bf16 = jax.block_until_ready(mlp_pallas(x, w1, b1, w2, b2))
    assert y_bf16.shape == (B, T, C)
    assert jnp.allclose(y_bf16, y_ref, atol=1e-2, rtol=1e-2), "bf16 path mismatch"

    print("KERNEL_OK")
</pallas_src>

<mosaic_0001>
module attributes {stable_mosaic.version = 11 : i64} {
  func.func @mlp_kernel(%arg0: i32, %arg1: memref<16x128xf32, #tpu.memory_space<vmem>>, %arg2: memref<128x128xf32, #tpu.memory_space<vmem>>, %arg3: memref<1x128xf32, #tpu.memory_space<vmem>>, %arg4: memref<128x128xf32, #tpu.memory_space<vmem>>, %arg5: memref<1x128xf32, #tpu.memory_space<vmem>>, %arg6: memref<16x128xf32, #tpu.memory_space<vmem>>) attributes {dimension_semantics = [#tpu.dimension_semantics<parallel>], iteration_bounds = array<i64: 1>, scalar_prefetch = 0 : i64, scratch_operands = 0 : i64, tpu.core_type = #tpu.core_type<tc>, window_params = [{transform_indices = @transform_0, window_bounds = array<i64: 16, 128>}, {pipeline_mode = #tpu.pipeline_mode<synchronous>, transform_indices = @transform_1, window_bounds = array<i64: 128, 128>}, {pipeline_mode = #tpu.pipeline_mode<synchronous>, transform_indices = @transform_2, window_bounds = array<i64: 1, 128>}, {pipeline_mode = #tpu.pipeline_mode<synchronous>, transform_indices = @transform_3, window_bounds = array<i64: 128, 128>}, {pipeline_mode = #tpu.pipeline_mode<synchronous>, transform_indices = @transform_4, window_bounds = array<i64: 1, 128>}, {transform_indices = @transform_5, window_bounds = array<i64: 16, 128>}]} {
    %c0 = arith.constant 0 : index
    %c0_0 = arith.constant 0 : index
    %0 = vector.load %arg1[%c0, %c0_0] : memref<16x128xf32, #tpu.memory_space<vmem>>, vector<16x128xf32>
    %cst = arith.constant 0.000000e+00 : f32
    %1 = vector.broadcast %cst : f32 to vector<16x128xf32>
    %c0_1 = arith.constant 0 : index
    %c0_2 = arith.constant 0 : index
    %2 = vector.load %arg2[%c0_1, %c0_2] : memref<128x128xf32, #tpu.memory_space<vmem>>, vector<128x128xf32>
    %cst_3 = arith.constant dense<0.000000e+00> : vector<16x128xf32>
    %3 = tpu.matmul %0, %2, %cst_3 {dimension_numbers = #tpu.dot_dimension_numbers<[1], [0], [0], [1], [0, 0, 1, 1], [], []>} : vector<16x128xf32>, vector<128x128xf32>, vector<16x128xf32> -> vector<16x128xf32>
    %c0_4 = arith.constant 0 : index
    %c0_5 = arith.constant 0 : index
    %4 = vector.load %arg3[%c0_4, %c0_5] : memref<1x128xf32, #tpu.memory_space<vmem>>, vector<1x128xf32>
    %5 = vector.broadcast %4 : vector<1x128xf32> to vector<16x128xf32>
    %6 = arith.addf %3, %5 : vector<16x128xf32>
    %cst_6 = arith.constant 0.636619746 : f32
    %7 = math.sqrt %cst_6 : f32
    %cst_7 = arith.constant 5.000000e-01 : f32
    %8 = vector.broadcast %cst_7 : f32 to vector<16x128xf32>
    %9 = arith.mulf %8, %6 : vector<16x128xf32>
    %10 = arith.mulf %6, %6 : vector<16x128xf32>
    %11 = arith.mulf %10, %6 : vector<16x128xf32>
    %cst_8 = arith.constant 4.471500e-02 : f32
    %12 = vector.broadcast %cst_8 : f32 to vector<16x128xf32>
    %13 = arith.mulf %12, %11 : vector<16x128xf32>
    %14 = arith.addf %6, %13 : vector<16x128xf32>
    %15 = vector.broadcast %7 : f32 to vector<16x128xf32>
    %16 = arith.mulf %15, %14 : vector<16x128xf32>
    %17 = math.tanh %16 : vector<16x128xf32>
    %cst_9 = arith.constant 1.000000e+00 : f32
    %18 = vector.broadcast %cst_9 : f32 to vector<16x128xf32>
    %19 = arith.addf %18, %17 : vector<16x128xf32>
    %20 = arith.mulf %9, %19 : vector<16x128xf32>
    %c0_10 = arith.constant 0 : index
    %c0_11 = arith.constant 0 : index
    %21 = vector.load %arg4[%c0_10, %c0_11] : memref<128x128xf32, #tpu.memory_space<vmem>>, vector<128x128xf32>
    %cst_12 = arith.constant dense<0.000000e+00> : vector<16x128xf32>
    %22 = tpu.matmul %20, %21, %cst_12 {dimension_numbers = #tpu.dot_dimension_numbers<[1], [0], [0], [1], [0, 0, 1, 1], [], []>} : vector<16x128xf32>, vector<128x128xf32>, vector<16x128xf32> -> vector<16x128xf32>
    %23 = arith.addf %1, %22 : vector<16x128xf32>
    %c0_13 = arith.constant 0 : index
    %c0_14 = arith.constant 0 : index
    %24 = vector.load %arg5[%c0_13, %c0_14] : memref<1x128xf32, #tpu.memory_space<vmem>>, vector<1x128xf32>
    %25 = vector.broadcast %24 : vector<1x128xf32> to vector<16x128xf32>
    %26 = arith.addf %23, %25 : vector<16x128xf32>
    %c0_15 = arith.constant 0 : index
    %c0_16 = arith.constant 0 : index
    %27 = vector.load %arg6[%c0_15, %c0_16] : memref<16x128xf32, #tpu.memory_space<vmem>>, vector<16x128xf32>
    tpu.vector_store %arg6[%c0_15, %c0_16], %26 {strides = array<i32>} : memref<16x128xf32, #tpu.memory_space<vmem>>, vector<16x128xf32>,
    return
  }
  func.func @transform_0(%arg0: i32) -> (i32, i32) {
    %c0_i32 = arith.constant 0 : i32
    %c0_i32_0 = arith.constant 0 : i32
    return %arg0, %c0_i32 : i32, i32
  }
  func.func @transform_1(%arg0: i32) -> (i32, i32) {
    %c0_i32 = arith.constant 0 : i32
    %c0_i32_0 = arith.constant 0 : i32
    %c0_i32_1 = arith.constant 0 : i32
    return %c0_i32, %c0_i32_0 : i32, i32
  }
  func.func @transform_2(%arg0: i32) -> (i32, i32) {
    %c0_i32 = arith.constant 0 : i32
    %c0_i32_0 = arith.constant 0 : i32
    %c0_i32_1 = arith.constant 0 : i32
    return %c0_i32, %c0_i32_0 : i32, i32
  }
  func.func @transform_3(%arg0: i32) -> (i32, i32) {
    %c0_i32 = arith.constant 0 : i32
    %c0_i32_0 = arith.constant 0 : i32
    %c0_i32_1 = arith.constant 0 : i32
    return %c0_i32, %c0_i32_0 : i32, i32
  }
  func.func @transform_4(%arg0: i32) -> (i32, i32) {
    %c0_i32 = arith.constant 0 : i32
    %c0_i32_0 = arith.constant 0 : i32
    %c0_i32_1 = arith.constant 0 : i32
    return %c0_i32, %c0_i32_0 : i32, i32
  }
  func.func @transform_5(%arg0: i32) -> (i32, i32) {
    %c0_i32 = arith.constant 0 : i32
    %c0_i32_0 = arith.constant 0 : i32
    return %arg0, %c0_i32 : i32, i32
  }
}

module attributes {stable_mosaic.version = 11 : i64} {
  func.func @mlp_kernel(%arg0: i32, %arg1: memref<16x128xf32, #tpu.memory_space<vmem>>, %arg2: memref<128x128xf32, #tpu.memory_space<vmem>>, %arg3: memref<1x128xf32, #tpu.memory_space<vmem>>, %arg4: memref<128x128xf32, #tpu.memory_space<vmem>>, %arg5: memref<1x128xf32, #tpu.memory_space<vmem>>, %arg6: memref<16x128xf32, #tpu.memory_space<vmem>>) attributes {dimension_semantics = [#tpu.dimension_semantics<parallel>], iteration_bounds = array<i64: 1>, scalar_prefetch = 0 : i64, scratch_operands = 0 : i64, tpu.core_type = #tpu.core_type<tc>, window_params = [{transform_indices = @transform_0, window_bounds = array<i64: 16, 128>}, {pipeline_mode = #tpu.pipeline_mode<synchronous>, transform_indices = @transform_1, window_bounds = array<i64: 128, 128>}, {pipeline_mode = #tpu.pipeline_mode<synchronous>, transform_indices = @transform_2, window_bounds = array<i64: 1, 128>}, {pipeline_mode = #tpu.pipeline_mode<synchronous>, transform_indices = @transform_3, window_bounds = array<i64: 128, 128>}, {pipeline_mode = #tpu.pipeline_mode<synchronous>, transform_indices = @transform_4, window_bounds = array<i64: 1, 128>}, {transform_indices = @transform_5, window_bounds = array<i64: 16, 128>}]} {
    %c0 = arith.constant 0 : index
    %c0_0 = arith.constant 0 : index
    %0 = vector.load %arg1[%c0, %c0_0] : memref<16x128xf32, #tpu.memory_space<vmem>>, vector<16x128xf32>
    %cst = arith.constant 0.000000e+00 : f32
    %1 = vector.broadcast %cst : f32 to vector<16x128xf32>
    %c0_1 = arith.constant 0 : index
    %c0_2 = arith.constant 0 : index
    %2 = vector.load %arg2[%c0_1, %c0_2] : memref<128x128xf32, #tpu.memory_space<vmem>>, vector<128x128xf32>
    %cst_3 = arith.constant dense<0.000000e+00> : vector<16x128xf32>
    %3 = tpu.matmul %0, %2, %cst_3 {dimension_numbers = #tpu.dot_dimension_numbers<[1], [0], [0], [1], [0, 0, 1, 1], [], []>} : vector<16x128xf32>, vector<128x128xf32>, vector<16x128xf32> -> vector<16x128xf32>
    %c0_4 = arith.constant 0 : index
    %c0_5 = arith.constant 0 : index
    %4 = vector.load %arg3[%c0_4, %c0_5] : memref<1x128xf32, #tpu.memory_space<vmem>>, vector<1x128xf32>
    %5 = vector.broadcast %4 : vector<1x128xf32> to vector<16x128xf32>
    %6 = arith.addf %3, %5 : vector<16x128xf32>
    %cst_6 = arith.constant 0.636619746 : f32
    %7 = math.sqrt %cst_6 : f32
    %cst_7 = arith.constant 5.000000e-01 : f32
    %8 = vector.broadcast %cst_7 : f32 to vector<16x128xf32>
    %9 = arith.mulf %8, %6 : vector<16x128xf32>
    %10 = arith.mulf %6, %6 : vector<16x128xf32>
    %11 = arith.mulf %10, %6 : vector<16x128xf32>
    %cst_8 = arith.constant 4.471500e-02 : f32
    %12 = vector.broadcast %cst_8 : f32 to vector<16x128xf32>
    %13 = arith.mulf %12, %11 : vector<16x128xf32>
    %14 = arith.addf %6, %13 : vector<16x128xf32>
    %15 = vector.broadcast %7 : f32 to vector<16x128xf32>
    %16 = arith.mulf %15, %14 : vector<16x128xf32>
    %17 = math.tanh %16 : vector<16x128xf32>
    %cst_9 = arith.constant 1.000000e+00 : f32
    %18 = vector.broadcast %cst_9 : f32 to vector<16x128xf32>
    %19 = arith.addf %18, %17 : vector<16x128xf32>
    %20 = arith.mulf %9, %19 : vector<16x128xf32>
    %c0_10 = arith.constant 0 : index
    %c0_11 = arith.constant 0 : index
    %21 = vector.load %arg4[%c0_10, %c0_11] : memref<128x128xf32, #tpu.memory_space<vmem>>, vector<128x128xf32>
    %cst_12 = arith.constant dense<0.000000e+00> : vector<16x128xf32>
    %22 = tpu.matmul %20, %21, %cst_12 {dimension_numbers = #tpu.dot_dimension_numbers<[1], [0], [0], [1], [0, 0, 1, 1], [], []>} : vector<16x128xf32>, vector<128x128xf32>, vector<16x128xf32> -> vector<16x128xf32>
    %23 = arith.addf %1, %22 : vector<16x128xf32>
    %c0_13 = arith.constant 0 : index
    %c0_14 = arith.constant 0 : index
    %24 = vector.load %arg5[%c0_13, %c0_14] : memref<1x128xf32, #tpu.memory_space<vmem>>, vector<1x128xf32>
    %25 = vector.broadcast %24 : vector<1x128xf32> to vector<16x128xf32>
    %26 = arith.addf %23, %25 : vector<16x128xf32>
    %c0_15 = arith.constant 0 : index
    %c0_16 = arith.constant 0 : index
    %27 = vector.load %arg6[%c0_15, %c0_16] : memref<16x128xf32, #tpu.memory_space<vmem>>, vector<16x128xf32>
    tpu.vector_store %arg6[%c0_15, %c0_16], %26 {strides = array<i32>} : memref<16x128xf32, #tpu.memory_space<vmem>>, vector<16x128xf32>,
    return
  }
  func.func @transform_0(%arg0: i32) -> (i32, i32) {
    %c0_i32 = arith.constant 0 : i32
    %c0_i32_0 = arith.constant 0 : i32
    return %arg0, %c0_i32 : i32, i32
  }
  func.func @transform_1(%arg0: i32) -> (i32, i32) {
    %c0_i32 = arith.constant 0 : i32
    %c0_i32_0 = arith.constant 0 : i32
    %c0_i32_1 = arith.constant 0 : i32
    return %c0_i32, %c0_i32_0 : i32, i32
  }
  func.func @transform_2(%arg0: i32) -> (i32, i32) {
    %c0_i32 = arith.constant 0 : i32
    %c0_i32_0 = arith.constant 0 : i32
    %c0_i32_1 = arith.constant 0 : i32
    return %c0_i32, %c0_i32_0 : i32, i32
  }
  func.func @transform_3(%arg0: i32) -> (i32, i32) {
    %c0_i32 = arith.constant 0 : i32
    %c0_i32_0 = arith.constant 0 : i32
    %c0_i32_1 = arith.constant 0 : i32
    return %c0_i32, %c0_i32_0 : i32, i32
  }
  func.func @transform_4(%arg0: i32) -> (i32, i32) {
    %c0_i32 = arith.constant 0 : i32
    %c0_i32_0 = arith.constant 0 : i32
    %c0_i32_1 = arith.constant 0 : i32
    return %c0_i32, %c0_i32_0 : i32, i32
  }
  func.func @transform_5(%arg0: i32) -> (i32, i32) {
    %c0_i32 = arith.constant 0 : i32
    %c0_i32_0 = arith.constant 0 : i32
    return %arg0, %c0_i32 : i32, i32
  }
}

</mosaic_0001>

<bundles_post_ra>
// kernel: tpu_custom_call.1
= control target key start
LH: loop header
LB: loop body
LE: loop exit
PB: predicated region body
PF: predicated region fallthrough
CT: control target
= control target key end

     0   :  { %10 = vsyncpa [#allocation3], 0  ;;  %s408_s0 = inlined_call_operand.hbm [shape: f32[16,128], index: 0, kind: input, shape index: {}]   ;;  %s409_s1 = inlined_call_operand.hbm [shape: f32[128,128], index: 1, kind: input, shape index: {}]   ;;  %s410_s2 = inlined_call_operand.vmem [shape: f32[1,128], index: 2, kind: input, shape index: {}]   ;;  %s411_s3 = inlined_call_operand.hbm [shape: f32[128,128], index: 3, kind: input, shape index: {}]   ;;  %s412_s4 = inlined_call_operand.vmem [shape: f32[1,128], index: 4, kind: input, shape index: {}]   ;;  %s413_s5 = inlined_call_operand.hbm [shape: f32[16,128], index: 5, kind: output, shape index: {}]  }
   0x1   :  { %11 = vsyncpa [#allocation6], 0 }
   0x2   :  { %12 = vsyncpa [#allocation4], 0  ;;  %s30_s20 = sshll.u32 %s409_s1, 4  ;;  %s342_s21 = smov [#allocation5]   ;;  %s31_s20 = int_to_ptr.hbm [resolvable:$true] %s30_s20 }
   0x3   :  { %s32_s22 = sshll.u32 %s342_s21, 4  ;;  %s17_s25 = sshll.u32 %s408_s0, 4  ;;  %s33_s22 = int_to_ptr.vmem [resolvable:$true] %s32_s22  ;;  %s18_s25 = int_to_ptr.hbm [resolvable:$true] %s17_s25 }
   0x4   :  { %s343_s26 = smov 128   ;;  %s344_s27 = smov 8  }
   0x5   :  { %38 = dma.hbm_to_vmem [thread:$0]  %s31_s20, 2048, %s33_s22, [#allocation6], %s343_s26, %s343_s26, %s344_s27  }
   0x6   :  { %s345_s28 = smov [#allocation2]   ;;  %s45_s1 = sshll.u32 %s411_s3, 4  ;;  %s46_s1 = int_to_ptr.hbm [resolvable:$true] %s45_s1 }
   0x7   :  { %s19_s29 = sshll.u32 %s345_s28, 4  ;;  %s346_s0 = smov [#allocation7]   ;;  %s20_s29 = int_to_ptr.vmem [resolvable:$true] %s19_s29 }
   0x8   :  { %25 = dma.hbm_to_vmem [thread:$0]  %s18_s25, 256, %s20_s29, [#allocation3], %s343_s26, %s343_s26, %s344_s27  }
   0x9   :  { %s47_s7 = sshll.u32 %s346_s0, 4  ;;  %s48_s7 = int_to_ptr.vmem [resolvable:$true] %s47_s7 }
   0xa   :  { %53 = dma.hbm_to_vmem [thread:$0]  %s46_s1, 2048, %s48_s7, [#allocation6], %s343_s26, %s343_s26, %s344_s27  }
   0xb   :  { %336 = dma.done.wait [#allocation3], 256  }
   0xc   :  { %337 = vsyncadd [#allocation3], 4294967040 }
   0xd   :  { %338 = dma.done.wait [#allocation6], 4096  }
   0xe   :  { %339 = vsyncadd [#allocation6], 4294963200  ;;  %v85_v0 = vld [vmem:[#allocation5 + $0x78] sm:$0xff]  ;;  %v84_v1 = vld [vmem:[#allocation5 + $0x70] sm:$0xff]  ;;  %s347_s10 = smov [#allocation8]   ;;  %s182_s14 = sshll.u32 %s413_s5, 4  ;;  %s183_s14 = int_to_ptr.hbm [resolvable:$true] %s182_s14 }
   0xf   :  { %90 = vmatpush.msra.mxu0 %v85_v0  ;;  %196 = vmatpush.msra.mxu2 %v85_v0  ;;  %v83_v2 = vld [vmem:[#allocation5 + $0x68] sm:$0xff]  ;;  %v82_v3 = vld [vmem:[#allocation5 + $0x60] sm:$0xff]  ;;  %v81_v4 = vld [vmem:[#allocation5 + $0x58] sm:$0xff]  ;;  %s180_s11 = sshll.u32 %s347_s10, 4  ;;  %s181_s11 = int_to_ptr.vmem [resolvable:$true] %s180_s11 }
  0x10   :  { %v146_v5 = vld [vmem:[#allocation7 + $0x78] sm:$0xff]  ;;  %v145_v6 = vld [vmem:[#allocation7 + $0x70] sm:$0xff]  ;;  %v144_v8 = vld [vmem:[#allocation7 + $0x68] sm:$0xff] }
  0x11   :  { %91 = vmatpush.msra.mxu0 %v84_v1  ;;  %197 = vmatpush.msra.mxu2 %v84_v1  ;;  %v80_v7 = vld [vmem:[#allocation5 + $0x50] sm:$0xff]  ;;  %v79_v9 = vld [vmem:[#allocation5 + $0x48] sm:$0xff]  ;;  %v143_v10 = vld [vmem:[#allocation7 + $0x60] sm:$0xff] }
  0x12   :  { %151 = vmatpush.msra.mxu1 %v146_v5  ;;  %212 = vmatpush.msra.mxu3 %v146_v5  ;;  %v78_v11 = vld [vmem:[#allocation5 + $0x40] sm:$0xff]  ;;  %v77_v12 = vld [vmem:[#allocation5 + $0x38] sm:$0xff]  ;;  %v76_v13 = vld [vmem:[#allocation5 + $0x30] sm:$0xff] }
  0x13   :  { %92 = vmatpush.msra.mxu0 %v83_v2  ;;  %198 = vmatpush.msra.mxu2 %v83_v2  ;;  %v75_v14 = vld [vmem:[#allocation5 + $0x28] sm:$0xff]  ;;  %v74_v15 = vld [vmem:[#allocation5 + $0x20] sm:$0xff]  ;;  %v73_v16 = vld [vmem:[#allocation5 + $0x18] sm:$0xff] }
  0x14   :  { %152 = vmatpush.msra.mxu1 %v145_v6  ;;  %213 = vmatpush.msra.mxu3 %v145_v6  ;;  %v72_v17 = vld [vmem:[#allocation5 + $0x10] sm:$0xff]  ;;  %v71_v18 = vld [vmem:[#allocation5 + $0x8] sm:$0xff]  ;;  %v70_v19 = vld [vmem:[#allocation5] sm:$0xff] }
  0x15   :  { %93 = vmatpush.msra.mxu0 %v82_v3  ;;  %199 = vmatpush.msra.mxu2 %v82_v3  ;;  %v68_v20 = vld [vmem:[#allocation2] sm:$0xff]  ;;  %v69_v21 = vld [vmem:[#allocation2 + $0x8] sm:$0xff]  ;;  %v140_v24 = vld [vmem:[#allocation7 + $0x48] sm:$0xff] }
  0x16   :  { %153 = vmatpush.msra.mxu1 %v144_v8  ;;  %214 = vmatpush.msra.mxu3 %v144_v8  ;;  %v142_v22 = vld [vmem:[#allocation7 + $0x58] sm:$0xff]  ;;  %v141_v23 = vld [vmem:[#allocation7 + $0x50] sm:$0xff]  ;;  %v139_v25 = vld [vmem:[#allocation7 + $0x40] sm:$0xff] }
  0x17   :  { %94 = vmatpush.msra.mxu0 %v81_v4  ;;  %200 = vmatpush.msra.mxu2 %v81_v4  ;;  %v138_v26 = vld [vmem:[#allocation7 + $0x38] sm:$0xff]  ;;  %v137_v27 = vld [vmem:[#allocation7 + $0x30] sm:$0xff]  ;;  %v136_v28 = vld [vmem:[#allocation7 + $0x28] sm:$0xff] }
  0x18   :  { %154 = vmatpush.msra.mxu1 %v143_v10  ;;  %215 = vmatpush.msra.mxu3 %v143_v10  ;;  %v135_v29 = vld [vmem:[#allocation7 + $0x20] sm:$0xff]  ;;  %v134_v30 = vld [vmem:[#allocation7 + $0x18] sm:$0xff]  ;;  %v133_v31 = vld [vmem:[#allocation7 + $0x10] sm:$0xff] }
  0x19   :  { %95 = vmatpush.msra.mxu0 %v80_v7  ;;  %201 = vmatpush.msra.mxu2 %v80_v7  ;;  %v132_v32 = vld [vmem:[#allocation7 + $0x8] sm:$0xff]  ;;  %v131_v33 = vld [vmem:[#allocation7] sm:$0xff]  ;;  %v234_v34 = vld [vmem:[%s410_s2] ss:$0 sm:$0xff] }
  0x1a   :  { %155 = vmatpush.msra.mxu1 %v142_v22  ;;  %216 = vmatpush.msra.mxu3 %v142_v22  ;;  %v235_v57 = vld [vmem:[%s412_s4] ss:$0 sm:$0xff] }
  0x1b   :  { %96 = vmatpush.msra.mxu0 %v79_v9  ;;  %202 = vmatpush.msra.mxu2 %v79_v9 }
  0x1c   :  { %156 = vmatpush.msra.mxu1 %v141_v23  ;;  %217 = vmatpush.msra.mxu3 %v141_v23 }
  0x1d   :  { %97 = vmatpush.msra.mxu0 %v78_v11  ;;  %203 = vmatpush.msra.mxu2 %v78_v11 }
  0x1e   :  { %157 = vmatpush.msra.mxu1 %v140_v24  ;;  %218 = vmatpush.msra.mxu3 %v140_v24 }
  0x1f   :  { %98 = vmatpush.msra.mxu0 %v77_v12  ;;  %204 = vmatpush.msra.mxu2 %v77_v12 }
  0x20   :  { %158 = vmatpush.msra.mxu1 %v139_v25  ;;  %219 = vmatpush.msra.mxu3 %v139_v25 }
  0x21   :  { %99 = vmatpush.msra.mxu0 %v76_v13  ;;  %205 = vmatpush.msra.mxu2 %v76_v13 }
  0x22   :  { %159 = vmatpush.msra.mxu1 %v138_v26  ;;  %220 = vmatpush.msra.mxu3 %v138_v26 }
  0x23   :  { %100 = vmatpush.msra.mxu0 %v75_v14  ;;  %206 = vmatpush.msra.mxu2 %v75_v14 }
  0x24   :  { %160 = vmatpush.msra.mxu1 %v137_v27  ;;  %221 = vmatpush.msra.mxu3 %v137_v27 }
  0x25   :  { %101 = vmatpush.msra.mxu0 %v74_v15  ;;  %207 = vmatpush.msra.mxu2 %v74_v15 }
  0x26   :  { %161 = vmatpush.msra.mxu1 %v136_v28  ;;  %222 = vmatpush.msra.mxu3 %v136_v28 }
  0x27   :  { %102 = vmatpush.msra.mxu0 %v73_v16  ;;  %208 = vmatpush.msra.mxu2 %v73_v16 }
  0x28   :  { %162 = vmatpush.msra.mxu1 %v135_v29  ;;  %223 = vmatpush.msra.mxu3 %v135_v29 }
  0x29   :  { %103 = vmatpush.msra.mxu0 %v72_v17  ;;  %209 = vmatpush.msra.mxu2 %v72_v17 }
  0x2a   :  { %163 = vmatpush.msra.mxu1 %v134_v30  ;;  %224 = vmatpush.msra.mxu3 %v134_v30 }
  0x2b   :  { %104 = vmatpush.msra.mxu0 %v71_v18  ;;  %210 = vmatpush.msra.mxu2 %v71_v18 }
  0x2c   :  { %164 = vmatpush.msra.mxu1 %v133_v31  ;;  %225 = vmatpush.msra.mxu3 %v133_v31 }
  0x2d   :  { %105 = vmatpush.msra.mxu0 %v70_v19  ;;  %211 = vmatpush.msra.mxu2 %v70_v19 }
  0x2e   :  { %106 = vmatmul.f32.vlgmr.msra.gmra.mxu0 %v68_v20  ;;  %109 = vmatmul.f32.vlgmr.msra.gmra.mxu2 %v69_v21 }
  0x2f   :  { %165 = vmatpush.msra.mxu1 %v132_v32  ;;  %226 = vmatpush.msra.mxu3 %v132_v32 }
  0x31   :  { %166 = vmatpush.msra.mxu1 %v131_v33  ;;  %227 = vmatpush.msra.mxu3 %v131_v33 }
  0xab   :  { %v107_v35 = vpop.f32.mrf.mxu0 }
  0xac   :  { %v108_v36 = vadd.f32 %v234_v34, %v107_v35 }
  0xae   :  { %v115_v37 = vmul.f32 %v108_v36, %v108_v36  ;;  %v113_v50 = vmul.f32 0.5, %v108_v36 }
  0xb0   :  { %v117_v38 = vmul.f32 %v115_v37, %v108_v36 }
  0xb1   :  { %v110_v39 = vpop.f32.mrf.mxu2 }
  0xb2   :  { %v111_v40 = vadd.f32 %v234_v34, %v110_v39  ;;  %v119_v41 = vmul.f32 0.044715, %v117_v38 }
  0xb4   :  { %v116_v42 = vmul.f32 %v111_v40, %v111_v40  ;;  %v121_v43 = vadd.f32 %v119_v41, %v108_v36  ;;  %v114_v54 = vmul.f32 0.5, %v111_v40 }
  0xb6   :  { %v118_v44 = vmul.f32 %v116_v42, %v111_v40  ;;  %v123_v45 = vmul.f32 0.7978845, %v121_v43 }
  0xb8   :  { %236 = vtanh.f32 %v123_v45  ;;  %v120_v46 = vmul.f32 0.044715, %v118_v44 }
  0xba   :  { %v122_v47 = vadd.f32 %v120_v46, %v111_v40 }
  0xbc   :  { %v124_v48 = vmul.f32 0.7978845, %v122_v47 }
  0xbe   :  { %v237_v49 = vpop.eup %236  ;;  %238 = vtanh.f32 %v124_v48 }
  0xbf   :  { %v127_v51 = vadd.f32 1.0, %v237_v49 }
  0xc1   :  { %v129_v52 = vmul.f32 %v127_v51, %v113_v50 }
  0xc3   :  { %167 = vmatmul.f32.vlgmr.msra.gmra.mxu1 %v129_v52 }
  0xc4   :  { %v239_v53 = vpop.eup %238 }
  0xc5   :  { %v128_v55 = vadd.f32 1.0, %v239_v53 }
  0xc7   :  { %v130_v56 = vmul.f32 %v128_v55, %v114_v54 }
  0xc9   :  { %170 = vmatmul.f32.vlgmr.msra.gmra.mxu3 %v130_v56 }
 0x140   :  { %v168_v58 = vpop.f32.mrf.mxu1 }
 0x141   :  { %v169_v59 = vadd.f32 %v235_v57, %v168_v58 }
 0x143   :  { %174 = vst [vmem:[#allocation8] sm:$0xff] %v169_v59 }
 0x14c   :  { %v171_v60 = vpop.f32.mrf.mxu3 }
 0x14d   :  { %v172_v61 = vadd.f32 %v235_v57, %v171_v60 }
 0x14f   :  { %175 = vst [vmem:[#allocation8 + $0x8] sm:$0xff] %v172_v61 }
 0x150   :  { %188 = dma.vmem_to_hbm [thread:$0]  %s181_s11, 256, %s183_s14, [#allocation4], %s343_s26, %s343_s26, %s344_s27  }
 0x151   :  { %340 = dma.done.wait [#allocation4], 256  }
 0x152   :  { %341 = vsyncadd [#allocation4], 4294967040 }
 0x153   :  { %193 = vsyncpa [#allocation3], 1 }
 0x154   :  { %194 = vsyncpa [#allocation6], 1 }
 0x155   :  { %195 = vsyncpa [#allocation4], 1 }

// kernel: tpu_custom_call.1
= control target key start
LH: loop header
LB: loop body
LE: loop exit
PB: predicated region body
PF: predicated region fallthrough
CT: control target
= control target key end

     0   :  { %10 = vsyncpa [#allocation3], 0  ;;  %s408_s0 = inlined_call_operand.hbm [shape: f32[16,128], index: 0, kind: input, shape index: {}]   ;;  %s409_s1 = inlined_call_operand.hbm [shape: f32[128,128], index: 1, kind: input, shape index: {}]   ;;  %s410_s2 = inlined_call_operand.vmem [shape: f32[1,128], index: 2, kind: input, shape index: {}]   ;;  %s411_s3 = inlined_call_operand.hbm [shape: f32[128,128], index: 3, kind: input, shape index: {}]   ;;  %s412_s4 = inlined_call_operand.vmem [shape: f32[1,128], index: 4, kind: input, shape index: {}]   ;;  %s413_s5 = inlined_call_operand.hbm [shape: f32[16,128], index: 5, kind: output, shape index: {}]  }
   0x1   :  { %11 = vsyncpa [#allocation6], 0 }
   0x2   :  { %12 = vsyncpa [#allocation4], 0  ;;  %s30_s20 = sshll.u32 %s409_s1, 4  ;;  %s342_s21 = smov [#allocation5]   ;;  %s31_s20 = int_to_ptr.hbm [resolvable:$true] %s30_s20 }
   0x3   :  { %s32_s22 = sshll.u32 %s342_s21, 4  ;;  %s17_s25 = sshll.u32 %s408_s0, 4  ;;  %s33_s22 = int_to_ptr.vmem [resolvable:$true] %s32_s22  ;;  %s18_s25 = int_to_ptr.hbm [resolvable:$true] %s17_s25 }
   0x4   :  { %s343_s26 = smov 128   ;;  %s344_s27 = smov 8  }
   0x5   :  { %38 = dma.hbm_to_vmem [thread:$0]  %s31_s20, 2048, %s33_s22, [#allocation6], %s343_s26, %s343_s26, %s344_s27  }
   0x6   :  { %s345_s28 = smov [#allocation2]   ;;  %s45_s1 = sshll.u32 %s411_s3, 4  ;;  %s46_s1 = int_to_ptr.hbm [resolvable:$true] %s45_s1 }
   0x7   :  { %s19_s29 = sshll.u32 %s345_s28, 4  ;;  %s346_s0 = smov [#allocation7]   ;;  %s20_s29 = int_to_ptr.vmem [resolvable:$true] %s19_s29 }
   0x8   :  { %25 = dma.hbm_to_vmem [thread:$0]  %s18_s25, 256, %s20_s29, [#allocation3], %s343_s26, %s343_s26, %s344_s27  }
   0x9   :  { %s47_s7 = sshll.u32 %s346_s0, 4  ;;  %s48_s7 = int_to_ptr.vmem [resolvable:$true] %s47_s7 }
   0xa   :  { %53 = dma.hbm_to_vmem [thread:$0]  %s46_s1, 2048, %s48_s7, [#allocation6], %s343_s26, %s343_s26, %s344_s27  }
   0xb   :  { %336 = dma.done.wait [#allocation3], 256  }
   0xc   :  { %337 = vsyncadd [#allocation3], 4294967040 }
   0xd   :  { %338 = dma.done.wait [#allocation6], 4096  }
   0xe   :  { %339 = vsyncadd [#allocation6], 4294963200  ;;  %v85_v0 = vld [vmem:[#allocation5 + $0x78] sm:$0xff]  ;;  %v84_v1 = vld [vmem:[#allocation5 + $0x70] sm:$0xff]  ;;  %s347_s10 = smov [#allocation8]   ;;  %s182_s14 = sshll.u32 %s413_s5, 4  ;;  %s183_s14 = int_to_ptr.hbm [resolvable:$true] %s182_s14 }
   0xf   :  { %90 = vmatpush.msra.mxu0 %v85_v0  ;;  %196 = vmatpush.msra.mxu2 %v85_v0  ;;  %v83_v2 = vld [vmem:[#allocation5 + $0x68] sm:$0xff]  ;;  %v82_v3 = vld [vmem:[#allocation5 + $0x60] sm:$0xff]  ;;  %v81_v4 = vld [vmem:[#allocation5 + $0x58] sm:$0xff]  ;;  %s180_s11 = sshll.u32 %s347_s10, 4  ;;  %s181_s11 = int_to_ptr.vmem [resolvable:$true] %s180_s11 }
  0x10   :  { %v146_v5 = vld [vmem:[#allocation7 + $0x78] sm:$0xff]  ;;  %v145_v6 = vld [vmem:[#allocation7 + $0x70] sm:$0xff]  ;;  %v144_v8 = vld [vmem:[#allocation7 + $0x68] sm:$0xff] }
  0x11   :  { %91 = vmatpush.msra.mxu0 %v84_v1  ;;  %197 = vmatpush.msra.mxu2 %v84_v1  ;;  %v80_v7 = vld [vmem:[#allocation5 + $0x50] sm:$0xff]  ;;  %v79_v9 = vld [vmem:[#allocation5 + $0x48] sm:$0xff]  ;;  %v143_v10 = vld [vmem:[#allocation7 + $0x60] sm:$0xff] }
  0x12   :  { %151 = vmatpush.msra.mxu1 %v146_v5  ;;  %212 = vmatpush.msra.mxu3 %v146_v5  ;;  %v78_v11 = vld [vmem:[#allocation5 + $0x40] sm:$0xff]  ;;  %v77_v12 = vld [vmem:[#allocation5 + $0x38] sm:$0xff]  ;;  %v76_v13 = vld [vmem:[#allocation5 + $0x30] sm:$0xff] }
  0x13   :  { %92 = vmatpush.msra.mxu0 %v83_v2  ;;  %198 = vmatpush.msra.mxu2 %v83_v2  ;;  %v75_v14 = vld [vmem:[#allocation5 + $0x28] sm:$0xff]  ;;  %v74_v15 = vld [vmem:[#allocation5 + $0x20] sm:$0xff]  ;;  %v73_v16 = vld [vmem:[#allocation5 + $0x18] sm:$0xff] }
  0x14   :  { %152 = vmatpush.msra.mxu1 %v145_v6  ;;  %213 = vmatpush.msra.mxu3 %v145_v6  ;;  %v72_v17 = vld [vmem:[#allocation5 + $0x10] sm:$0xff]  ;;  %v71_v18 = vld [vmem:[#allocation5 + $0x8] sm:$0xff]  ;;  %v70_v19 = vld [vmem:[#allocation5] sm:$0xff] }
  0x15   :  { %93 = vmatpush.msra.mxu0 %v82_v3  ;;  %199 = vmatpush.msra.mxu2 %v82_v3  ;;  %v68_v20 = vld [vmem:[#allocation2] sm:$0xff]  ;;  %v69_v21 = vld [vmem:[#allocation2 + $0x8] sm:$0xff]  ;;  %v140_v24 = vld [vmem:[#allocation7 + $0x48] sm:$0xff] }
  0x16   :  { %153 = vmatpush.msra.mxu1 %v144_v8  ;;  %214 = vmatpush.msra.mxu3 %v144_v8  ;;  %v142_v22 = vld [vmem:[#allocation7 + $0x58] sm:$0xff]  ;;  %v141_v23 = vld [vmem:[#allocation7 + $0x50] sm:$0xff]  ;;  %v139_v25 = vld [vmem:[#allocation7 + $0x40] sm:$0xff] }
  0x17   :  { %94 = vmatpush.msra.mxu0 %v81_v4  ;;  %200 = vmatpush.msra.mxu2 %v81_v4  ;;  %v138_v26 = vld [vmem:[#allocation7 + $0x38] sm:$0xff]  ;;  %v137_v27 = vld [vmem:[#allocation7 + $0x30] sm:$0xff]  ;;  %v136_v28 = vld [vmem:[#allocation7 + $0x28] sm:$0xff] }
  0x18   :  { %154 = vmatpush.msra.mxu1 %v143_v10  ;;  %215 = vmatpush.msra.mxu3 %v143_v10  ;;  %v135_v29 = vld [vmem:[#allocation7 + $0x20] sm:$0xff]  ;;  %v134_v30 = vld [vmem:[#allocation7 + $0x18] sm:$0xff]  ;;  %v133_v31 = vld [vmem:[#allocation7 + $0x10] sm:$0xff] }
  0x19   :  { %95 = vmatpush.msra.mxu0 %v80_v7  ;;  %201 = vmatpush.msra.mxu2 %v80_v7  ;;  %v132_v32 = vld [vmem:[#allocation7 + $0x8] sm:$0xff]  ;;  %v131_v33 = vld [vmem:[#allocation7] sm:$0xff]  ;;  %v234_v34 = vld [vmem:[%s410_s2] ss:$0 sm:$0xff] }
  0x1a   :  { %155 = vmatpush.msra.mxu1 %v142_v22  ;;  %216 = vmatpush.msra.mxu3 %v142_v22  ;;  %v235_v57 = vld [vmem:[%s412_s4] ss:$0 sm:$0xff] }
  0x1b   :  { %96 = vmatpush.msra.mxu0 %v79_v9  ;;  %202 = vmatpush.msra.mxu2 %v79_v9 }
  0x1c   :  { %156 = vmatpush.msra.mxu1 %v141_v23  ;;  %217 = vmatpush.msra.mxu3 %v141_v23 }
  0x1d   :  { %97 = vmatpush.msra.mxu0 %v78_v11  ;;  %203 = vmatpush.msra.mxu2 %v78_v11 }
  0x1e   :  { %157 = vmatpush.msra.mxu1 %v140_v24  ;;  %218 = vmatpush.msra.mxu3 %v140_v24 }
  0x1f   :  { %98 = vmatpush.msra.mxu0 %v77_v12  ;;  %204 = vmatpush.msra.mxu2 %v77_v12 }
  0x20   :  { %158 = vmatpush.msra.mxu1 %v139_v25  ;;  %219 = vmatpush.msra.mxu3 %v139_v25 }
  0x21   :  { %99 = vmatpush.msra.mxu0 %v76_v13  ;;  %205 = vmatpush.msra.mxu2 %v76_v13 }
  0x22   :  { %159 = vmatpush.msra.mxu1 %v138_v26  ;;  %220 = vmatpush.msra.mxu3 %v138_v26 }
  0x23   :  { %100 = vmatpush.msra.mxu0 %v75_v14  ;;  %206 = vmatpush.msra.mxu2 %v75_v14 }
  0x24   :  { %160 = vmatpush.msra.mxu1 %v137_v27  ;;  %221 = vmatpush.msra.mxu3 %v137_v27 }
  0x25   :  { %101 = vmatpush.msra.mxu0 %v74_v15  ;;  %207 = vmatpush.msra.mxu2 %v74_v15 }
  0x26   :  { %161 = vmatpush.msra.mxu1 %v136_v28  ;;  %222 = vmatpush.msra.mxu3 %v136_v28 }
  0x27   :  { %102 = vmatpush.msra.mxu0 %v73_v16  ;;  %208 = vmatpush.msra.mxu2 %v73_v16 }
  0x28   :  { %162 = vmatpush.msra.mxu1 %v135_v29  ;;  %223 = vmatpush.msra.mxu3 %v135_v29 }
  0x29   :  { %103 = vmatpush.msra.mxu0 %v72_v17  ;;  %209 = vmatpush.msra.mxu2 %v72_v17 }
  0x2a   :  { %163 = vmatpush.msra.mxu1 %v134_v30  ;;  %224 = vmatpush.msra.mxu3 %v134_v30 }
  0x2b   :  { %104 = vmatpush.msra.mxu0 %v71_v18  ;;  %210 = vmatpush.msra.mxu2 %v71_v18 }
  0x2c   :  { %164 = vmatpush.msra.mxu1 %v133_v31  ;;  %225 = vmatpush.msra.mxu3 %v133_v31 }
  0x2d   :  { %105 = vmatpush.msra.mxu0 %v70_v19  ;;  %211 = vmatpush.msra.mxu2 %v70_v19 }
  0x2e   :  { %106 = vmatmul.f32.vlgmr.msra.gmra.mxu0 %v68_v20  ;;  %109 = vmatmul.f32.vlgmr.msra.gmra.mxu2 %v69_v21 }
  0x2f   :  { %165 = vmatpush.msra.mxu1 %v132_v32  ;;  %226 = vmatpush.msra.mxu3 %v132_v32 }
  0x31   :  { %166 = vmatpush.msra.mxu1 %v131_v33  ;;  %227 = vmatpush.msra.mxu3 %v131_v33 }
  0xab   :  { %v107_v35 = vpop.f32.mrf.mxu0 }
  0xac   :  { %v108_v36 = vadd.f32 %v234_v34, %v107_v35 }
  0xae   :  { %v115_v37 = vmul.f32 %v108_v36, %v108_v36  ;;  %v113_v50 = vmul.f32 0.5, %v108_v36 }
  0xb0   :  { %v117_v38 = vmul.f32 %v115_v37, %v108_v36 }
  0xb1   :  { %v110_v39 = vpop.f32.mrf.mxu2 }
  0xb2   :  { %v111_v40 = vadd.f32 %v234_v34, %v110_v39  ;;  %v119_v41 = vmul.f32 0.044715, %v117_v38 }
  0xb4   :  { %v116_v42 = vmul.f32 %v111_v40, %v111_v40  ;;  %v121_v43 = vadd.f32 %v119_v41, %v108_v36  ;;  %v114_v54 = vmul.f32 0.5, %v111_v40 }
  0xb6   :  { %v118_v44 = vmul.f32 %v116_v42, %v111_v40  ;;  %v123_v45 = vmul.f32 0.7978845, %v121_v43 }
  0xb8   :  { %236 = vtanh.f32 %v123_v45  ;;  %v120_v46 = vmul.f32 0.044715, %v118_v44 }
  0xba   :  { %v122_v47 = vadd.f32 %v120_v46, %v111_v40 }
  0xbc   :  { %v124_v48 = vmul.f32 0.7978845, %v122_v47 }
  0xbe   :  { %v237_v49 = vpop.eup %236  ;;  %238 = vtanh.f32 %v124_v48 }
  0xbf   :  { %v127_v51 = vadd.f32 1.0, %v237_v49 }
  0xc1   :  { %v129_v52 = vmul.f32 %v127_v51, %v113_v50 }
  0xc3   :  { %167 = vmatmul.f32.vlgmr.msra.gmra.mxu1 %v129_v52 }
  0xc4   :  { %v239_v53 = vpop.eup %238 }
  0xc5   :  { %v128_v55 = vadd.f32 1.0, %v239_v53 }
  0xc7   :  { %v130_v56 = vmul.f32 %v128_v55, %v114_v54 }
  0xc9   :  { %170 = vmatmul.f32.vlgmr.msra.gmra.mxu3 %v130_v56 }
 0x140   :  { %v168_v58 = vpop.f32.mrf.mxu1 }
 0x141   :  { %v169_v59 = vadd.f32 %v235_v57, %v168_v58 }
 0x143   :  { %174 = vst [vmem:[#allocation8] sm:$0xff] %v169_v59 }
 0x14c   :  { %v171_v60 = vpop.f32.mrf.mxu3 }
 0x14d   :  { %v172_v61 = vadd.f32 %v235_v57, %v171_v60 }
 0x14f   :  { %175 = vst [vmem:[#allocation8 + $0x8] sm:$0xff] %v172_v61 }
 0x150   :  { %188 = dma.vmem_to_hbm [thread:$0]  %s181_s11, 256, %s183_s14, [#allocation4], %s343_s26, %s343_s26, %s344_s27  }
 0x151   :  { %340 = dma.done.wait [#allocation4], 256  }
 0x152   :  { %341 = vsyncadd [#allocation4], 4294967040 }
 0x153   :  { %193 = vsyncpa [#allocation3], 1 }
 0x154   :  { %194 = vsyncpa [#allocation6], 1 }
 0x155   :  { %195 = vsyncpa [#allocation4], 1 }

</bundles_post_ra>
